<compile_context>
chip_gen: v7x
topology: tpu7x:2x2x1
jax: 0.10.0
libtpu: 0.0.40
codegen_flags: <defaults>
</compile_context>

<pallas_src>
import jax
import jax.numpy as jnp
from jax.experimental import pallas as pl
from jax.experimental.pallas import tpu as pltpu


def _round_up(n, m):
    return ((n + m - 1) // m) * m


def _softplus(x):
    # Numerically stable softplus using only exp/log (guaranteed Mosaic lowering).
    return jnp.maximum(x, 0.0) + jnp.log(1.0 + jnp.exp(-jnp.abs(x)))


def vpg_mlp_kernel(std_off_ref,                     # scalar prefetch (SMEM)
                   x_ref, w1_ref, b1_ref, w2_ref, b2_ref,
                   wm_ref, bm_ref, ws_ref, bs_ref,  # inputs (VMEM)
                   mean_ref, logstd_ref, std_ref):  # outputs (VMEM, lane-dense)
    # Layer 1: (tb, 8) @ (8, H1) + b1, ReLU   (bf16 operands, f32 accumulate)
    xb = x_ref[...].astype(jnp.bfloat16)
    h1 = jnp.dot(xb, w1_ref[...], preferred_element_type=jnp.float32)
    h1 = jnp.maximum(h1 + b1_ref[...], 0.0)
    # Layer 2: (tb, H1) @ (H1, H2) + b2, ReLU
    h2 = jnp.dot(h1.astype(jnp.bfloat16), w2_ref[...],
                 preferred_element_type=jnp.float32)
    h2 = jnp.maximum(h2 + b2_ref[...], 0.0)
    # Fused head: mean and log_std as separate lane-dense (tb, 128) matmuls.
    h2b = h2.astype(jnp.bfloat16)
    mean = jnp.dot(h2b, wm_ref[...], preferred_element_type=jnp.float32) + bm_ref[...]
    log_std = jnp.dot(h2b, ws_ref[...], preferred_element_type=jnp.float32) + bs_ref[...]
    std = _softplus(log_std) + std_off_ref[0]
    mean_ref[...] = mean.astype(mean_ref.dtype)
    logstd_ref[...] = log_std.astype(logstd_ref.dtype)
    std_ref[...] = std.astype(std_ref.dtype)


def vpg_apply(x, params, *, std_offset=1.0, act_dim=2, block_b=512):
    """Fused VPG forward. Returns (logits, mean, std); logits == PyTorch forward()."""
    w1, b1, w2, b2, wm, bm, ws, bs = params
    B, obs = x.shape
    in_pad, H1 = w1.shape
    H2, out_pad = wm.shape

    # Pad feature dim to the MXU-friendly in_pad (zero rows in w1 make this exact).
    if obs < in_pad:
        x = jnp.pad(x, ((0, 0), (0, in_pad - obs)))
    # Pad batch to a multiple of the batch tile (tile multiple of 8 sublanes).
    tb = min(block_b, _round_up(B, 8))
    Bp = _round_up(B, tb)
    if Bp != B:
        x = jnp.pad(x, ((0, Bp - B), (0, 0)))

    grid = (Bp // tb,)
    std_off = jnp.full((1,), std_offset, dtype=jnp.float32)

    # index_maps receive the scalar-prefetch ref as a trailing positional arg.
    x_spec = pl.BlockSpec((tb, in_pad), lambda i, so: (i, 0))
    full = lambda shp: pl.BlockSpec(shp, lambda i, so: (0, 0))
    out_spec = pl.BlockSpec((tb, out_pad), lambda i, so: (i, 0))

    def _nb(a):
        return int(a.size) * a.dtype.itemsize

    cost = pl.CostEstimate(
        flops=int(2 * Bp * (in_pad * H1 + H1 * H2 + 2 * H2 * out_pad)),
        transcendentals=int(2 * Bp * out_pad),
        bytes_accessed=int(_nb(x) + sum(_nb(p) for p in params)
                           + 3 * Bp * out_pad * 4 + 4),
    )

    mean_p, logstd_p, std_p = pl.pallas_call(
        vpg_mlp_kernel,
        out_shape=(jax.ShapeDtypeStruct((Bp, out_pad), jnp.float32),
                   jax.ShapeDtypeStruct((Bp, out_pad), jnp.float32),
                   jax.ShapeDtypeStruct((Bp, out_pad), jnp.float32)),
        grid_spec=pltpu.PrefetchScalarGridSpec(
            num_scalar_prefetch=1,
            grid=grid,
            in_specs=[
                x_spec,
                full((in_pad, H1)), full((1, H1)),
                full((H1, H2)), full((1, H2)),
                full((H2, out_pad)), full((1, out_pad)),
                full((H2, out_pad)), full((1, out_pad)),
            ],
            out_specs=[out_spec, out_spec, out_spec],
        ),
        compiler_params=pltpu.CompilerParams(
            dimension_semantics=("parallel",)),
        cost_estimate=cost,
    )(std_off, x, w1, b1, w2, b2, wm, bm, ws, bs)

    mean = mean_p[:B, :act_dim]
    log_std = logstd_p[:B, :act_dim]
    std = std_p[:B, :act_dim]
    logits = jnp.concatenate([mean, log_std], axis=-1)
    return logits, mean, std


def vpg_get_distribution(x, params, std_offset, *, act_dim=2):
    """Equivalent of VPG.get_distribution: returns (mean, std) of the Normal.
    The caller owns the decaying std_offset state (std_offset *= 0.99997)."""
    # TODO(synk): torch.distributions.Normal object itself (sample/log_prob) stays in plain JAX.
    _, mean, std = vpg_apply(x, params, std_offset=std_offset, act_dim=act_dim)
    return mean, std


def init_vpg_params(key, obs_dim=6, act_dim=2, hl=(128, 128),
                    obs_pad=8, out_pad=128, w_dtype=jnp.bfloat16):
    """PyTorch-style uniform(+/-1/sqrt(fan_in)) init, then pad/split for the TPU layout:
       w1 rows padded obs_dim->obs_pad (zeros); final layer split into mean / log_std
       heads, each column-padded to out_pad. Weights stored in bf16, biases in f32."""
    dims = [obs_dim, *hl, act_dim * 2]
    raw = []
    for i in range(len(dims) - 1):
        fan_in, fan_out = dims[i], dims[i + 1]
        key, kw, kb = jax.random.split(key, 3)
        bound = 1.0 / jnp.sqrt(jnp.float32(fan_in))
        w = jax.random.uniform(kw, (fan_in, fan_out), jnp.float32, -bound, bound)
        b = jax.random.uniform(kb, (1, fan_out), jnp.float32, -bound, bound)
        raw.append((w, b))
    (w1, b1), (w2, b2), (w3, b3) = raw

    w1p = jnp.zeros((obs_pad, hl[0]), jnp.float32).at[:obs_dim].set(w1)
    wm = jnp.zeros((hl[-1], out_pad), jnp.float32).at[:, :act_dim].set(w3[:, :act_dim])
    ws = jnp.zeros((hl[-1], out_pad), jnp.float32).at[:, :act_dim].set(w3[:, act_dim:])
    bm = jnp.zeros((1, out_pad), jnp.float32).at[:, :act_dim].set(b3[:, :act_dim])
    bs = jnp.zeros((1, out_pad), jnp.float32).at[:, :act_dim].set(b3[:, act_dim:])

    return (w1p.astype(w_dtype), b1,
            w2.astype(w_dtype), b2,
            wm.astype(w_dtype), bm,
            ws.astype(w_dtype), bs)


def vpg_ref(x, params, *, act_dim=2, std_offset=1.0):
    """Plain-JAX reference mirroring the kernel's bf16-operand / f32-accumulate math."""
    w1, b1, w2, b2, wm, bm, ws, bs = params
    f32 = lambda a: a.astype(jnp.float32)
    hp = jax.lax.Precision.HIGHEST
    in_pad = w1.shape[0]
    xp = jnp.pad(x, ((0, 0), (0, in_pad - x.shape[1]))).astype(jnp.bfloat16)
    h1 = jnp.maximum(jnp.dot(f32(xp), f32(w1), precision=hp) + b1, 0.0)
    h2 = jnp.maximum(jnp.dot(f32(h1.astype(jnp.bfloat16)), f32(w2), precision=hp) + b2, 0.0)
    h2b = f32(h2.astype(jnp.bfloat16))
    mean = (jnp.dot(h2b, f32(wm), precision=hp) + bm)[:, :act_dim]
    log_std = (jnp.dot(h2b, f32(ws), precision=hp) + bs)[:, :act_dim]
    std = jax.nn.softplus(log_std) + std_offset
    logits = jnp.concatenate([mean, log_std], axis=-1)
    return logits, mean, std


if __name__ == "__main__":
    key = jax.random.PRNGKey(0)
    key, kx = jax.random.split(key)

    obs_dim, act_dim, hl = 6, 2, (128, 128)
    batch = 8

    params = init_vpg_params(key, obs_dim=obs_dim, act_dim=act_dim, hl=hl)
    x = jax.random.normal(kx, (batch, obs_dim), jnp.float32)

    logits, mean, std = vpg_apply(x, params, std_offset=1.0, act_dim=act_dim)
    jax.block_until_ready((logits, mean, std))

    # Correctness vs. plain-JAX reference (same bf16-operand rounding).
    ref_logits, ref_mean, ref_std = vpg_ref(x, params, act_dim=act_dim, std_offset=1.0)
    assert logits.shape == (batch, act_dim * 2)
    assert mean.shape == (batch, act_dim) and std.shape == (batch, act_dim)
    assert jnp.allclose(logits, ref_logits, atol=1e-3, rtol=1e-3)
    assert jnp.allclose(mean, ref_mean, atol=1e-3, rtol=1e-3)
    assert jnp.allclose(std, ref_std, atol=1e-3, rtol=1e-3)
    assert bool(jnp.all(std > 0.0))

    # Exercise the distribution path (decaying std_offset goes through scalar prefetch,
    # so no recompilation between calls).
    mean2, std2 = vpg_get_distribution(x, params, std_offset=1.0 * 0.99997, act_dim=act_dim)
    jax.block_until_ready((mean2, std2))

    print("KERNEL_OK")
</pallas_src>

<mosaic_0001>
module attributes {stable_mosaic.version = 11 : i64} {
  func.func @vpg_mlp_kernel(%arg0: i32, %arg1: memref<1xf32, #tpu.memory_space<smem>>, %arg2: memref<8x8xf32, #tpu.memory_space<vmem>>, %arg3: memref<8x128xbf16, #tpu.memory_space<vmem>>, %arg4: memref<1x128xf32, #tpu.memory_space<vmem>>, %arg5: memref<128x128xbf16, #tpu.memory_space<vmem>>, %arg6: memref<1x128xf32, #tpu.memory_space<vmem>>, %arg7: memref<128x128xbf16, #tpu.memory_space<vmem>>, %arg8: memref<1x128xf32, #tpu.memory_space<vmem>>, %arg9: memref<128x128xbf16, #tpu.memory_space<vmem>>, %arg10: memref<1x128xf32, #tpu.memory_space<vmem>>, %arg11: memref<8x128xf32, #tpu.memory_space<vmem>>, %arg12: memref<8x128xf32, #tpu.memory_space<vmem>>, %arg13: memref<8x128xf32, #tpu.memory_space<vmem>>) attributes {dimension_semantics = [#tpu.dimension_semantics<parallel>], iteration_bounds = array<i64: 1>, scalar_prefetch = 1 : i64, scratch_operands = 0 : i64, tpu.core_type = #tpu.core_type<tc>, window_params = [{transform_indices = @transform_0, window_bounds = array<i64: 8, 8>}, {pipeline_mode = #tpu.pipeline_mode<synchronous>, transform_indices = @transform_1, window_bounds = array<i64: 8, 128>}, {pipeline_mode = #tpu.pipeline_mode<synchronous>, transform_indices = @transform_2, window_bounds = array<i64: 1, 128>}, {pipeline_mode = #tpu.pipeline_mode<synchronous>, transform_indices = @transform_3, window_bounds = array<i64: 128, 128>}, {pipeline_mode = #tpu.pipeline_mode<synchronous>, transform_indices = @transform_4, window_bounds = array<i64: 1, 128>}, {pipeline_mode = #tpu.pipeline_mode<synchronous>, transform_indices = @transform_5, window_bounds = array<i64: 128, 128>}, {pipeline_mode = #tpu.pipeline_mode<synchronous>, transform_indices = @transform_6, window_bounds = array<i64: 1, 128>}, {pipeline_mode = #tpu.pipeline_mode<synchronous>, transform_indices = @transform_7, window_bounds = array<i64: 128, 128>}, {pipeline_mode = #tpu.pipeline_mode<synchronous>, transform_indices = @transform_8, window_bounds = array<i64: 1, 128>}, {transform_indices = @transform_9, window_bounds = array<i64: 8, 128>}, {transform_indices = @transform_10, window_bounds = array<i64: 8, 128>}, {transform_indices = @transform_11, window_bounds = array<i64: 8, 128>}]} {
    %c0 = arith.constant 0 : index
    %c0_0 = arith.constant 0 : index
    %0 = vector.load %arg2[%c0, %c0_0] : memref<8x8xf32, #tpu.memory_space<vmem>>, vector<8x8xf32>
    %1 = arith.truncf %0 : vector<8x8xf32> to vector<8x8xbf16>
    %c0_1 = arith.constant 0 : index
    %c0_2 = arith.constant 0 : index
    %2 = vector.load %arg3[%c0_1, %c0_2] : memref<8x128xbf16, #tpu.memory_space<vmem>>, vector<8x128xbf16>
    %cst = arith.constant dense<0.000000e+00> : vector<8x128xf32>
    %3 = tpu.matmul %1, %2, %cst {dimension_numbers = #tpu.dot_dimension_numbers<[1], [0], [0], [1], [0, 0, 1, 1], [], []>} : vector<8x8xbf16>, vector<8x128xbf16>, vector<8x128xf32> -> vector<8x128xf32>
    %c0_3 = arith.constant 0 : index
    %c0_4 = arith.constant 0 : index
    %4 = vector.load %arg4[%c0_3, %c0_4] : memref<1x128xf32, #tpu.memory_space<vmem>>, vector<1x128xf32>
    %5 = vector.broadcast %4 : vector<1x128xf32> to vector<8x128xf32>
    %6 = arith.addf %3, %5 : vector<8x128xf32>
    %cst_5 = arith.constant 0.000000e+00 : f32
    %7 = vector.broadcast %cst_5 : f32 to vector<8x128xf32>
    %8 = arith.maximumf %6, %7 : vector<8x128xf32>
    %9 = arith.truncf %8 : vector<8x128xf32> to vector<8x128xbf16>
    %c0_6 = arith.constant 0 : index
    %c0_7 = arith.constant 0 : index
    %10 = vector.load %arg5[%c0_6, %c0_7] : memref<128x128xbf16, #tpu.memory_space<vmem>>, vector<128x128xbf16>
    %cst_8 = arith.constant dense<0.000000e+00> : vector<8x128xf32>
    %11 = tpu.matmul %9, %10, %cst_8 {dimension_numbers = #tpu.dot_dimension_numbers<[1], [0], [0], [1], [0, 0, 1, 1], [], []>} : vector<8x128xbf16>, vector<128x128xbf16>, vector<8x128xf32> -> vector<8x128xf32>
    %c0_9 = arith.constant 0 : index
    %c0_10 = arith.constant 0 : index
    %12 = vector.load %arg6[%c0_9, %c0_10] : memref<1x128xf32, #tpu.memory_space<vmem>>, vector<1x128xf32>
    %13 = vector.broadcast %12 : vector<1x128xf32> to vector<8x128xf32>
    %14 = arith.addf %11, %13 : vector<8x128xf32>
    %cst_11 = arith.constant 0.000000e+00 : f32
    %15 = vector.broadcast %cst_11 : f32 to vector<8x128xf32>
    %16 = arith.maximumf %14, %15 : vector<8x128xf32>
    %17 = arith.truncf %16 : vector<8x128xf32> to vector<8x128xbf16>
    %c0_12 = arith.constant 0 : index
    %c0_13 = arith.constant 0 : index
    %18 = vector.load %arg7[%c0_12, %c0_13] : memref<128x128xbf16, #tpu.memory_space<vmem>>, vector<128x128xbf16>
    %cst_14 = arith.constant dense<0.000000e+00> : vector<8x128xf32>
    %19 = tpu.matmul %17, %18, %cst_14 {dimension_numbers = #tpu.dot_dimension_numbers<[1], [0], [0], [1], [0, 0, 1, 1], [], []>} : vector<8x128xbf16>, vector<128x128xbf16>, vector<8x128xf32> -> vector<8x128xf32>
    %c0_15 = arith.constant 0 : index
    %c0_16 = arith.constant 0 : index
    %20 = vector.load %arg8[%c0_15, %c0_16] : memref<1x128xf32, #tpu.memory_space<vmem>>, vector<1x128xf32>
    %21 = vector.broadcast %20 : vector<1x128xf32> to vector<8x128xf32>
    %22 = arith.addf %19, %21 : vector<8x128xf32>
    %c0_17 = arith.constant 0 : index
    %c0_18 = arith.constant 0 : index
    %23 = vector.load %arg9[%c0_17, %c0_18] : memref<128x128xbf16, #tpu.memory_space<vmem>>, vector<128x128xbf16>
    %cst_19 = arith.constant dense<0.000000e+00> : vector<8x128xf32>
    %24 = tpu.matmul %17, %23, %cst_19 {dimension_numbers = #tpu.dot_dimension_numbers<[1], [0], [0], [1], [0, 0, 1, 1], [], []>} : vector<8x128xbf16>, vector<128x128xbf16>, vector<8x128xf32> -> vector<8x128xf32>
    %c0_20 = arith.constant 0 : index
    %c0_21 = arith.constant 0 : index
    %25 = vector.load %arg10[%c0_20, %c0_21] : memref<1x128xf32, #tpu.memory_space<vmem>>, vector<1x128xf32>
    %26 = vector.broadcast %25 : vector<1x128xf32> to vector<8x128xf32>
    %27 = arith.addf %24, %26 : vector<8x128xf32>
    %cst_22 = arith.constant 0.000000e+00 : f32
    %28 = vector.broadcast %cst_22 : f32 to vector<8x128xf32>
    %29 = arith.maximumf %27, %28 : vector<8x128xf32>
    %30 = math.absf %27 : vector<8x128xf32>
    %cst_23 = arith.constant 0.000000e+00 : f32
    %31 = vector.broadcast %cst_23 : f32 to vector<8x128xf32>
    %32 = arith.subf %31, %30 : vector<8x128xf32>
    %33 = math.exp %32 : vector<8x128xf32>
    %cst_24 = arith.constant 1.000000e+00 : f32
    %34 = vector.broadcast %cst_24 : f32 to vector<8x128xf32>
    %35 = arith.addf %34, %33 : vector<8x128xf32>
    %36 = math.log %35 : vector<8x128xf32>
    %37 = arith.addf %29, %36 : vector<8x128xf32>
    %c0_25 = arith.constant 0 : index
    %38 = memref.load %arg1[%c0_25] : memref<1xf32, #tpu.memory_space<smem>>
    %39 = vector.broadcast %38 : f32 to vector<8x128xf32>
    %40 = arith.addf %37, %39 : vector<8x128xf32>
    %c0_26 = arith.constant 0 : index
    %c0_27 = arith.constant 0 : index
    %41 = vector.load %arg11[%c0_26, %c0_27] : memref<8x128xf32, #tpu.memory_space<vmem>>, vector<8x128xf32>
    tpu.vector_store %arg11[%c0_26, %c0_27], %22 {strides = array<i32>} : memref<8x128xf32, #tpu.memory_space<vmem>>, vector<8x128xf32>,
    %c0_28 = arith.constant 0 : index
    %c0_29 = arith.constant 0 : index
    %42 = vector.load %arg12[%c0_28, %c0_29] : memref<8x128xf32, #tpu.memory_space<vmem>>, vector<8x128xf32>
    tpu.vector_store %arg12[%c0_28, %c0_29], %27 {strides = array<i32>} : memref<8x128xf32, #tpu.memory_space<vmem>>, vector<8x128xf32>,
    %c0_30 = arith.constant 0 : index
    %c0_31 = arith.constant 0 : index
    %43 = vector.load %arg13[%c0_30, %c0_31] : memref<8x128xf32, #tpu.memory_space<vmem>>, vector<8x128xf32>
    tpu.vector_store %arg13[%c0_30, %c0_31], %40 {strides = array<i32>} : memref<8x128xf32, #tpu.memory_space<vmem>>, vector<8x128xf32>,
    return
  }
  func.func @transform_0(%arg0: i32, %arg1: memref<1xf32, #tpu.memory_space<smem>>) -> (i32, i32) {
    %c0_i32 = arith.constant 0 : i32
    %c0_i32_0 = arith.constant 0 : i32
    return %arg0, %c0_i32 : i32, i32
  }
  func.func @transform_1(%arg0: i32, %arg1: memref<1xf32, #tpu.memory_space<smem>>) -> (i32, i32) {
    %c0_i32 = arith.constant 0 : i32
    %c0_i32_0 = arith.constant 0 : i32
    %c0_i32_1 = arith.constant 0 : i32
    return %c0_i32, %c0_i32_0 : i32, i32
  }
  func.func @transform_2(%arg0: i32, %arg1: memref<1xf32, #tpu.memory_space<smem>>) -> (i32, i32) {
    %c0_i32 = arith.constant 0 : i32
    %c0_i32_0 = arith.constant 0 : i32
    %c0_i32_1 = arith.constant 0 : i32
    return %c0_i32, %c0_i32_0 : i32, i32
  }
  func.func @transform_3(%arg0: i32, %arg1: memref<1xf32, #tpu.memory_space<smem>>) -> (i32, i32) {
    %c0_i32 = arith.constant 0 : i32
    %c0_i32_0 = arith.constant 0 : i32
    %c0_i32_1 = arith.constant 0 : i32
    return %c0_i32, %c0_i32_0 : i32, i32
  }
  func.func @transform_4(%arg0: i32, %arg1: memref<1xf32, #tpu.memory_space<smem>>) -> (i32, i32) {
    %c0_i32 = arith.constant 0 : i32
    %c0_i32_0 = arith.constant 0 : i32
    %c0_i32_1 = arith.constant 0 : i32
    return %c0_i32, %c0_i32_0 : i32, i32
  }
  func.func @transform_5(%arg0: i32, %arg1: memref<1xf32, #tpu.memory_space<smem>>) -> (i32, i32) {
    %c0_i32 = arith.constant 0 : i32
    %c0_i32_0 = arith.constant 0 : i32
    %c0_i32_1 = arith.constant 0 : i32
    return %c0_i32, %c0_i32_0 : i32, i32
  }
  func.func @transform_6(%arg0: i32, %arg1: memref<1xf32, #tpu.memory_space<smem>>) -> (i32, i32) {
    %c0_i32 = arith.constant 0 : i32
    %c0_i32_0 = arith.constant 0 : i32
    %c0_i32_1 = arith.constant 0 : i32
    return %c0_i32, %c0_i32_0 : i32, i32
  }
  func.func @transform_7(%arg0: i32, %arg1: memref<1xf32, #tpu.memory_space<smem>>) -> (i32, i32) {
    %c0_i32 = arith.constant 0 : i32
    %c0_i32_0 = arith.constant 0 : i32
    %c0_i32_1 = arith.constant 0 : i32
    return %c0_i32, %c0_i32_0 : i32, i32
  }
  func.func @transform_8(%arg0: i32, %arg1: memref<1xf32, #tpu.memory_space<smem>>) -> (i32, i32) {
    %c0_i32 = arith.constant 0 : i32
    %c0_i32_0 = arith.constant 0 : i32
    %c0_i32_1 = arith.constant 0 : i32
    return %c0_i32, %c0_i32_0 : i32, i32
  }
  func.func @transform_9(%arg0: i32, %arg1: memref<1xf32, #tpu.memory_space<smem>>) -> (i32, i32) {
    %c0_i32 = arith.constant 0 : i32
    %c0_i32_0 = arith.constant 0 : i32
    return %arg0, %c0_i32 : i32, i32
  }
  func.func @transform_10(%arg0: i32, %arg1: memref<1xf32, #tpu.memory_space<smem>>) -> (i32, i32) {
    %c0_i32 = arith.constant 0 : i32
    %c0_i32_0 = arith.constant 0 : i32
    return %arg0, %c0_i32 : i32, i32
  }
  func.func @transform_11(%arg0: i32, %arg1: memref<1xf32, #tpu.memory_space<smem>>) -> (i32, i32) {
    %c0_i32 = arith.constant 0 : i32
    %c0_i32_0 = arith.constant 0 : i32
    return %arg0, %c0_i32 : i32, i32
  }
}

</mosaic_0001>

<bundles_post_ra>
// kernel: tpu_custom_call.1
= control target key start
LH: loop header
LB: loop body
LE: loop exit
PB: predicated region body
PF: predicated region fallthrough
CT: control target
= control target key end

     0   :  { %19 = vsyncpa [#allocation5], 0  ;;  %s1101_s0 = inlined_call_operand.<no memory space> [shape: f32[1], index: 0, kind: input, shape index: {}]   ;;  %s1102_s1 = inlined_call_operand.hbm [shape: f32[8,8], index: 1, kind: input, shape index: {}]   ;;  %s1103_s2 = inlined_call_operand.vmem [shape: bf16[8,128], index: 2, kind: input, shape index: {}]   ;;  %s1104_s3 = inlined_call_operand.vmem [shape: f32[1,128], index: 3, kind: input, shape index: {}]   ;;  %s1105_s4 = inlined_call_operand.hbm [shape: bf16[128,128], index: 4, kind: input, shape index: {}]   ;;  %s1106_s5 = inlined_call_operand.vmem [shape: f32[1,128], index: 5, kind: input, shape index: {}]   ;;  %s1107_s6 = inlined_call_operand.hbm [shape: bf16[128,128], index: 6, kind: input, shape index: {}]   ;;  %s1108_s7 = inlined_call_operand.vmem [shape: f32[1,128], index: 7, kind: input, shape index: {}]   ;;  %s1109_s8 = inlined_call_operand.hbm [shape: bf16[128,128], index: 8, kind: input, shape index: {}]   ;;  %s1110_s9 = inlined_call_operand.vmem [shape: f32[1,128], index: 9, kind: input, shape index: {}]   ;;  %s1111_s10 = inlined_call_operand.hbm [shape: f32[8,128], index: 10, kind: output, shape index: {0}]   ;;  %s1112_s11 = inlined_call_operand.hbm [shape: f32[8,128], index: 11, kind: output, shape index: {1}]   ;;  %s1113_s12 = inlined_call_operand.hbm [shape: f32[8,128], index: 12, kind: output, shape index: {2}]  }
   0x1   :  { %20 = vsyncpa [#allocation8], 0 }
   0x2   :  { %21 = vsyncpa [#allocation11], 0 }
   0x3   :  { %22 = vsyncpa [#allocation6], 0 }
   0x4   :  { %23 = vsyncpa [#allocation14], 0  ;;  %s874_s21 = smov [#allocation7]   ;;  %s710_s25 = scalar_lea.hbm %s1105_s4, 1024 }
   0x5   :  { %s43_s22 = sshll.u32 %s874_s21, 4  ;;  %p711_p0 = scmp.ne.s32.totalorder %s1105_s4, %s710_s25  ;;  %s44_s22 = int_to_ptr.vmem [resolvable:$true] %s43_s22 }
   0x6   :  { %p714_p1 = scmp.lt.u32.totalorder %s710_s25, %s1105_s4 }
   0x8   :  { %p716_p2 = pnand %p714_p1, %p711_p0 }
   0xa   :  { %719 = shalt.err (!%p716_p2)
}
   0xb   :  { %s720_s30 = scalar_lea.vmem %s44_s22, 1024  ;;  %p725_p4 = scmp.lt.s32.totalorder %s44_s22, %s44_s22 }
   0xc   :  { %p721_p3 = scmp.ne.s32.totalorder %s44_s22, %s720_s30  ;;  %p726_p5 = scmp.lt.s32.totalorder %s720_s30, %s720_s30 }
   0xe   :  { %p727_p6 = por %p726_p5, %p725_p4 }
  0x10   :  { %p728_p7 = pnand %p727_p6, %p721_p3 }
  0x12   :  { %731 = shalt.err (!%p728_p7)
}
  0x13   :  { %s875_s13 = smov 64   ;;  %s876_s14 = smov 4  }
  0x14   :  { %49 = dma.hbm_to_vmem [thread:$0]  %s1105_s4, 1024, %s44_s22, [#allocation8], %s875_s13, %s875_s13, %s876_s14  }
  0x15   :  { %s877_s17 = smov [#allocation4]   ;;  %s878_s19 = smov [#allocation9]  }
  0x16   :  { %s30_s18 = sshll.u32 %s877_s17, 4  ;;  %s57_s20 = sshll.u32 %s878_s19, 4  ;;  %s31_s18 = int_to_ptr.vmem [resolvable:$true] %s30_s18  ;;  %s58_s20 = int_to_ptr.vmem [resolvable:$true] %s57_s20 }
  0x17   :  { %s732_s24 = scalar_lea.hbm %s1102_s1, 128 }
  0x18   :  { %p733_p8 = scmp.ne.s32.totalorder %s1102_s1, %s732_s24  ;;  %p736_p9 = scmp.lt.u32.totalorder %s732_s24, %s1102_s1 }
  0x1a   :  { %p738_p10 = pnand %p736_p9, %p733_p8 }
  0x1c   :  { %741 = shalt.err (!%p738_p10)
}
  0x1d   :  { %s742_s4 = scalar_lea.vmem %s31_s18, 128  ;;  %p747_p12 = scmp.lt.s32.totalorder %s31_s18, %s31_s18 }
  0x1e   :  { %p743_p11 = scmp.ne.s32.totalorder %s31_s18, %s742_s4  ;;  %p748_p13 = scmp.lt.s32.totalorder %s742_s4, %s742_s4 }
  0x20   :  { %p749_p0 = por %p748_p13, %p747_p12 }
  0x22   :  { %p750_p1 = pnand %p749_p0, %p743_p11 }
  0x24   :  { %753 = shalt.err (!%p750_p1)
}
  0x25   :  { %33 = dma.hbm_to_vmem [thread:$0]  %s1102_s1, 128, %s31_s18, [#allocation5]  }
  0x26   :  { %s754_s16 = scalar_lea.hbm %s1107_s6, 1024 }
  0x27   :  { %p755_p2 = scmp.ne.s32.totalorder %s1107_s6, %s754_s16  ;;  %p758_p3 = scmp.lt.u32.totalorder %s754_s16, %s1107_s6 }
  0x29   :  { %p760_p4 = pnand %p758_p3, %p755_p2 }
  0x2b   :  { %763 = shalt.err (!%p760_p4)
}
  0x2c   :  { %s764_s24 = scalar_lea.vmem %s58_s20, 1024  ;;  %p769_p6 = scmp.lt.s32.totalorder %s58_s20, %s58_s20 }
  0x2d   :  { %p765_p5 = scmp.ne.s32.totalorder %s58_s20, %s764_s24  ;;  %p770_p7 = scmp.lt.s32.totalorder %s764_s24, %s764_s24 }
  0x2f   :  { %p771_p8 = por %p770_p7, %p769_p6 }
  0x31   :  { %p772_p9 = pnand %p771_p8, %p765_p5 }
  0x33   :  { %775 = shalt.err (!%p772_p9)
}
  0x34   :  { %63 = dma.hbm_to_vmem [thread:$0]  %s1107_s6, 1024, %s58_s20, [#allocation8], %s875_s13, %s875_s13, %s876_s14  }
  0x35   :  { %s879_s25 = smov [#allocation10]   ;;  %s776_s4 = scalar_lea.hbm %s1109_s8, 1024 }
  0x36   :  { %s71_s26 = sshll.u32 %s879_s25, 4  ;;  %p777_p10 = scmp.ne.s32.totalorder %s1109_s8, %s776_s4  ;;  %s72_s26 = int_to_ptr.vmem [resolvable:$true] %s71_s26 }
  0x37   :  { %p780_p11 = scmp.lt.u32.totalorder %s776_s4, %s1109_s8 }
  0x39   :  { %p782_p12 = pnand %p780_p11, %p777_p10 }
  0x3b   :  { %785 = shalt.err (!%p782_p12)
}
  0x3c   :  { %s786_s16 = scalar_lea.vmem %s72_s26, 1024  ;;  %p791_p0 = scmp.lt.s32.totalorder %s72_s26, %s72_s26 }
  0x3d   :  { %p787_p13 = scmp.ne.s32.totalorder %s72_s26, %s786_s16  ;;  %p792_p1 = scmp.lt.s32.totalorder %s786_s16, %s786_s16 }
  0x3f   :  { %p793_p2 = por %p792_p1, %p791_p0 }
  0x41   :  { %p794_p3 = pnand %p793_p2, %p787_p13 }
  0x43   :  { %797 = shalt.err (!%p794_p3)
}
  0x44   :  { %77 = dma.hbm_to_vmem [thread:$0]  %s1109_s8, 1024, %s72_s26, [#allocation11], %s875_s13, %s875_s13, %s876_s14  }
  0x45   :  { %864 = dma.done.wait [#allocation5], 128  }
  0x46   :  { %865 = vsyncadd [#allocation5], 4294967168 }
  0x47   :  { %866 = dma.done.wait [#allocation8], 2048  }
  0x48   :  { %867 = vsyncadd [#allocation8], 4294965248 }
  0x49   :  { %868 = dma.done.wait [#allocation11], 1024  }
  0x4a   :  { %869 = vsyncadd [#allocation11], 4294966272  ;;  %v880_v0 = vmov 0.0   ;;  %vm881_vm0 = vmmov 0   ;;  %vm107_vm1 = vcmask 1043456   ;;  %v93_v2 = vld [vmem:[#allocation4] sm:$0xff] }
  0x4b   :  { %605 = vmatprep.subr.bf16.mxu0 %v880_v0  ;;  %607 = vmatprep.mubr.msk.bf16.mxu0 %vm881_vm0, %v880_v0  ;;  %v95_v1 = vld [vmem:[%s1103_s2] sm:$0xf]  ;;  %v94_v4 = vpack.c.bf16 %v93_v2, %v93_v2  ;;  %v682_v5 = vld [vmem:[#allocation7] sm:$0xff]   ;;  %vm103_vm2 = vcmask 64512   ;;  %v683_v6 = vld [vmem:[#allocation7 + $0x8] sm:$0xff]   ;;  %s882_s1 = smov [#allocation13]  }
  0x4c   :  { %611 = vmatprep.subr.bf16.mxu1 %v880_v0  ;;  %627 = vmatprep.mubr.msk.bf16.mxu1 %vm881_vm0, %v880_v0  ;;  %v109_v3 = vsel %vm107_vm1, %v95_v1, 0  ;;  %v684_v7 = vld [vmem:[#allocation7 + $0x10] sm:$0xff]   ;;  %v685_v8 = vld [vmem:[#allocation7 + $0x18] sm:$0xff]   ;;  %v686_v9 = vld [vmem:[#allocation7 + $0x20] sm:$0xff]   ;;  %s519_s18 = sshll.u32 %s882_s1, 4  ;;  %s520_s18 = int_to_ptr.vmem [resolvable:$true] %s519_s18 }
  0x4d   :  { %606 = vmatpush3.bf16.msra.mxu0 %v109_v3  ;;  %612 = vmatpush3.bf16.msra.mxu1 %v682_v5  ;;  %v687_v10 = vld [vmem:[#allocation7 + $0x28] sm:$0xff]   ;;  %v688_v11 = vld [vmem:[#allocation7 + $0x30] sm:$0xff]   ;;  %v689_v12 = vld [vmem:[#allocation7 + $0x38] sm:$0xff]   ;;  %p803_p5 = scmp.lt.s32.totalorder %s520_s18, %s520_s18 }
  0x4e   :  { %631 = vmatprep.subr.bf16.mxu0 %v880_v0  ;;  %613 = vmatprep.subr.bf16.mxu1 %v880_v0  ;;  %v690_v13 = vld [vmem:[#allocation9] sm:$0xff]   ;;  %v692_v14 = vld [vmem:[#allocation9 + $0x8] sm:$0xff]   ;;  %v694_v15 = vld [vmem:[#allocation9 + $0x10] sm:$0xff]  }
  0x4f   :  { %v696_v16 = vld [vmem:[#allocation9 + $0x18] sm:$0xff]   ;;  %v698_v17 = vld [vmem:[#allocation9 + $0x20] sm:$0xff]   ;;  %v700_v18 = vld [vmem:[#allocation9 + $0x28] sm:$0xff]  }
  0x50   :  { %608 = vmatmul.mubr.msk.bf16.vlgmr.msra.gmra.mrb[0].mxu0 %vm103_vm2, %v94_v4  ;;  %v547_v19 = vld [vmem:[%s1104_s3] ss:$0 sm:$0xff]  ;;  %v691_v26 = vld [vmem:[#allocation10] sm:$0xff]   ;;  %v693_v28 = vld [vmem:[#allocation10 + $0x8] sm:$0xff]  }
  0x51   :  { %647 = vmatprep.mubr.msk.bf16.mxu0 %vm881_vm0, %v880_v0  ;;  %614 = vmatpush3.bf16.msra.mxu1 %v683_v6  ;;  %v695_v29 = vld [vmem:[#allocation10 + $0x10] sm:$0xff]   ;;  %v697_v30 = vld [vmem:[#allocation10 + $0x18] sm:$0xff]   ;;  %v699_v31 = vld [vmem:[#allocation10 + $0x20] sm:$0xff]  }
  0x52   :  { %615 = vmatprep.subr.bf16.mxu1 %v880_v0  ;;  %632 = vmatpush3.bf16.msra.mxu0 %v690_v13  ;;  %v701_v32 = vld [vmem:[#allocation10 + $0x28] sm:$0xff]   ;;  %v702_v33 = vld [vmem:[#allocation9 + $0x30] sm:$0xff]   ;;  %v704_v35 = vld [vmem:[#allocation9 + $0x38] sm:$0xff]  }
  0x53   :  { %633 = vmatprep.subr.bf16.mxu0 %v880_v0  ;;  %v703_v34 = vld [vmem:[#allocation10 + $0x30] sm:$0xff]   ;;  %v705_v36 = vld [vmem:[#allocation10 + $0x38] sm:$0xff]  }
  0x54   :  { %v549_v37 = vld [vmem:[%s1106_s5] ss:$0 sm:$0xff]  ;;  %s883_s5 = smov [#allocation12]  }
  0x55   :  { %616 = vmatpush3.bf16.msra.mxu1 %v684_v7  ;;  %v558_v45 = vld [vmem:[%s1108_s7] ss:$0 sm:$0xff]  ;;  %s509_s25 = sshll.u32 %s883_s5, 4  ;;  %s798_s7 = scalar_lea.vmem %s520_s18, 128  ;;  %s1055_s25 = int_to_ptr.vmem [resolvable:$true] %s509_s25 }
  0x56   :  { %617 = vmatprep.subr.bf16.mxu1 %v880_v0  ;;  %634 = vmatpush3.bf16.msra.mxu0 %v692_v14  ;;  %v567_v46 = vld [vmem:[%s1110_s9] ss:$0 sm:$0xff]  ;;  %p799_p4 = scmp.ne.s32.totalorder %s520_s18, %s798_s7  ;;  %p804_p6 = scmp.lt.s32.totalorder %s798_s7, %s798_s7 }
  0x57   :  { %635 = vmatprep.subr.bf16.mxu0 %v880_v0 }
  0x58   :  { %p805_p7 = por %p804_p6, %p803_p5 }
  0x59   :  { %618 = vmatpush3.bf16.msra.mxu1 %v685_v8 }
  0x5a   :  { %619 = vmatprep.subr.bf16.mxu1 %v880_v0  ;;  %636 = vmatpush3.bf16.msra.mxu0 %v694_v15  ;;  %p806_p8 = pnand %p805_p7, %p799_p4 }
  0x5b   :  { %637 = vmatprep.subr.bf16.mxu0 %v880_v0 }
  0x5d   :  { %620 = vmatpush3.bf16.msra.mxu1 %v686_v9 }
  0x5e   :  { %621 = vmatprep.subr.bf16.mxu1 %v880_v0  ;;  %638 = vmatpush3.bf16.msra.mxu0 %v696_v16 }
  0x5f   :  { %639 = vmatprep.subr.bf16.mxu0 %v880_v0 }
  0x61   :  { %622 = vmatpush3.bf16.msra.mxu1 %v687_v10 }
  0x62   :  { %623 = vmatprep.subr.bf16.mxu1 %v880_v0  ;;  %640 = vmatpush3.bf16.msra.mxu0 %v698_v17 }
  0x63   :  { %641 = vmatprep.subr.bf16.mxu0 %v880_v0 }
  0x65   :  { %624 = vmatpush3.bf16.msra.mxu1 %v688_v11 }
  0x66   :  { %625 = vmatprep.subr.bf16.mxu1 %v880_v0  ;;  %642 = vmatpush3.bf16.msra.mxu0 %v700_v18 }
  0x67   :  { %643 = vmatprep.subr.bf16.mxu0 %v880_v0 }
  0x69   :  { %626 = vmatpush3.bf16.msra.mxu1 %v689_v12 }
  0x6a   :  { %651 = vmatprep.subr.bf16.mxu1 %v880_v0  ;;  %644 = vmatpush3.bf16.msra.mxu0 %v702_v33 }
  0x6b   :  { %645 = vmatprep.subr.bf16.mxu0 %v880_v0 }
  0x6e   :  { %646 = vmatpush3.bf16.msra.mxu0 %v704_v35 }
 0x123   :  { %v145_v20 = vpop.f32.mrb[0].mxu0 }
 0x124   :  { %v146_v21 = vadd.f32 %v547_v19, %v145_v20  ;;  %v609_v22 = vpop.f32.mrb[1].mxu0 }
 0x125   :  { %v148_v23 = vpop.f32.mrb[2].mxu0 }
 0x126   :  { %v151_v24 = vmax.f32 %v146_v21, 0.0  ;;  %v610_v25 = vpop.f32.mrb[3].mxu0 }
 0x128   :  { %v152_v27 = vpack.c.bf16 %v151_v24, %v151_v24 }
 0x12a   :  { %628 = vmatmul.mubr.bf16.vlgmr.msra.gmra.mrb[0].mxu1 %v152_v27 }
 0x12b   :  { %652 = vmatpush3.bf16.msra.mxu1 %v691_v26  ;;  %667 = vmatprep.mubr.msk.bf16.mxu1 %vm881_vm0, %v880_v0 }
 0x12c   :  { %653 = vmatprep.subr.bf16.mxu1 %v880_v0 }
 0x12f   :  { %654 = vmatpush3.bf16.msra.mxu1 %v693_v28 }
 0x130   :  { %655 = vmatprep.subr.bf16.mxu1 %v880_v0 }
 0x133   :  { %656 = vmatpush3.bf16.msra.mxu1 %v695_v29 }
 0x134   :  { %657 = vmatprep.subr.bf16.mxu1 %v880_v0 }
 0x137   :  { %658 = vmatpush3.bf16.msra.mxu1 %v697_v30 }
 0x138   :  { %659 = vmatprep.subr.bf16.mxu1 %v880_v0 }
 0x13b   :  { %660 = vmatpush3.bf16.msra.mxu1 %v699_v31 }
 0x13c   :  { %661 = vmatprep.subr.bf16.mxu1 %v880_v0 }
 0x13f   :  { %662 = vmatpush3.bf16.msra.mxu1 %v701_v32 }
 0x140   :  { %663 = vmatprep.subr.bf16.mxu1 %v880_v0 }
 0x143   :  { %664 = vmatpush3.bf16.msra.mxu1 %v703_v34 }
 0x144   :  { %665 = vmatprep.subr.bf16.mxu1 %v880_v0 }
 0x147   :  { %666 = vmatpush3.bf16.msra.mxu1 %v705_v36 }
 0x1fd   :  { %v258_v38 = vpop.f32.mrb[0].mxu1 }
 0x1fe   :  { %v259_v39 = vadd.f32 %v549_v37, %v258_v38  ;;  %v629_v40 = vpop.f32.mrb[1].mxu1 }
 0x1ff   :  { %v261_v41 = vpop.f32.mrb[2].mxu1 }
 0x200   :  { %v264_v42 = vmax.f32 %v259_v39, 0.0  ;;  %v630_v43 = vpop.f32.mrb[3].mxu1 }
 0x202   :  { %v265_v44 = vpack.c.bf16 %v264_v42, %v264_v42 }
 0x204   :  { %648 = vmatmul.mubr.bf16.vlgmr.msra.gmra.mrb[4].mxu0 %v265_v44  ;;  %668 = vmatmul.mubr.bf16.vlgmr.msra.gmra.mrb[4].mxu1 %v265_v44 }
 0x2d7   :  { %v371_v47 = vpop.f32.mrb[4].mxu0  ;;  %v482_v48 = vpop.f32.mrb[4].mxu1 }
 0x2d8   :  { %v372_v49 = vadd.f32 %v558_v45, %v371_v47  ;;  %v483_v50 = vadd.f32 %v567_v46, %v482_v48  ;;  %v649_v51 = vpop.f32.mrb[5].mxu0  ;;  %v669_v52 = vpop.f32.mrb[5].mxu1 }
 0x2d9   :  { %v374_v53 = vpop.f32.mrb[6].mxu0  ;;  %v485_v54 = vpop.f32.mrb[6].mxu1 }
 0x2da   :  { %500 = vst [vmem:[#allocation12] sm:$0xff] %v372_v49  ;;  %v489_v55 = vand.u32 2147483647, %v483_v50  ;;  %501 = vst [vmem:[#allocation13] sm:$0xff] %v483_v50  ;;  %v650_v56 = vpop.f32.mrb[7].mxu0  ;;  %v670_v57 = vpop.f32.mrb[7].mxu1 }
 0x2db   :  { %809 = shalt.err (!%p806_p8)
}
 0x2dc   :  { %s810_s27 = scalar_lea.hbm %s1112_s11, 128 }
 0x2dd   :  { %p811_p9 = scmp.ne.s32.totalorder %s1112_s11, %s810_s27  ;;  %p814_p10 = scmp.lt.u32.totalorder %s810_s27, %s1112_s11 }
 0x2df   :  { %p816_p11 = pnand %p814_p10, %p811_p9 }
 0x2e1   :  { %819 = shalt.err (!%p816_p11)
}
 0x2e2   :  { %522 = dma.vmem_to_hbm [thread:$0]  %s520_s18, 128, %s1112_s11, [#allocation14]   ;;  %v490_v58 = vsub.f32 0.0, %v489_v55 }
 0x2e3   :  { %s820_s16 = scalar_lea.vmem %s1055_s25, 128  ;;  %p825_p13 = scmp.lt.s32.totalorder %s1055_s25, %s1055_s25 }
 0x2e4   :  { %p821_p12 = scmp.ne.s32.totalorder %s1055_s25, %s820_s16  ;;  %p826_p0 = scmp.lt.s32.totalorder %s820_s16, %s820_s16 }
 0x2e6   :  { %p827_p1 = por %p826_p0, %p825_p13 }
 0x2e8   :  { %p828_p2 = pnand %p827_p1, %p821_p12 }
 0x2ea   :  { %831 = shalt.err (!%p828_p2)
}
 0x2eb   :  { %s832_s8 = scalar_lea.hbm %s1111_s10, 128 }
 0x2ec   :  { %p833_p3 = scmp.ne.s32.totalorder %s1111_s10, %s832_s8  ;;  %p836_p4 = scmp.lt.u32.totalorder %s832_s8, %s1111_s10 }
 0x2ee   :  { %p838_p5 = pnand %p836_p4, %p833_p3 }
 0x2f0   :  { %841 = shalt.err (!%p838_p5)
}
 0x2f1   :  { %512 = dma.vmem_to_hbm [thread:$0]  %s1055_s25, 128, %s1111_s10, [#allocation6]   ;;  %v491_v59 = vmul.f32 1.442695, %v490_v58  ;;  %v488_v63 = vmax.f32 %v483_v50, 0.0  ;;  %v498_v1 = vstv %s1101_s0 }
 0x2f2   :  { %s884_s23 = smov [#allocation15]  }
 0x2f3   :  { %706 = vpow2.f32 %v491_v59  ;;  %s529_s24 = sshll.u32 %s884_s23, 4  ;;  %s530_s24 = int_to_ptr.vmem [resolvable:$true] %s529_s24 }
 0x2f4   :  { %s842_s1 = scalar_lea.vmem %s530_s24, 128  ;;  %p847_p7 = scmp.lt.s32.totalorder %s530_s24, %s530_s24 }
 0x2f5   :  { %p843_p6 = scmp.ne.s32.totalorder %s530_s24, %s842_s1  ;;  %p848_p8 = scmp.lt.s32.totalorder %s842_s1, %s842_s1 }
 0x2f7   :  { %p849_p9 = por %p848_p8, %p847_p7 }
 0x2f9   :  { %p850_p10 = pnand %p849_p9, %p843_p6 }
 0x2fd   :  { %v707_v60 = vpop.eup %706 }
 0x2fe   :  { %v493_v61 = vadd.f32 1.0, %v707_v60 }
 0x300   :  { %708 = vlog2.f32 %v493_v61 }
 0x30a   :  { %v709_v62 = vpop.eup %708 }
 0x30b   :  { %v495_v0 = vmul.f32 0.6931472, %v709_v62 }
 0x30d   :  { %v496_v2 = vadd.f32 %v495_v0, %v488_v63 }
 0x30f   :  { %v499_v3 = vadd.f32 %v498_v1, %v496_v2 }
 0x311   :  { %502 = vst [vmem:[#allocation15] sm:$0xff] %v499_v3 }
 0x312   :  { %853 = shalt.err (!%p850_p10)
}
 0x313   :  { %s854_s5 = scalar_lea.hbm %s1113_s12, 128 }
 0x314   :  { %p855_p11 = scmp.ne.s32.totalorder %s1113_s12, %s854_s5  ;;  %p858_p12 = scmp.lt.u32.totalorder %s854_s5, %s1113_s12 }
 0x316   :  { %p860_p13 = pnand %p858_p12, %p855_p11 }
 0x318   :  { %863 = shalt.err (!%p860_p13)
}
 0x319   :  { %532 = dma.vmem_to_hbm [thread:$0]  %s530_s24, 128, %s1113_s12, [#allocation14]  }
 0x31a   :  { %870 = dma.done.wait [#allocation6], 128  }
 0x31b   :  { %871 = vsyncadd [#allocation6], 4294967168 }
 0x31c   :  { %872 = dma.done.wait [#allocation14], 256  }
 0x31d   :  { %873 = vsyncadd [#allocation14], 4294967040 }
 0x31e   :  { %542 = vsyncpa [#allocation5], 1 }
 0x31f   :  { %543 = vsyncpa [#allocation8], 1 }
 0x320   :  { %544 = vsyncpa [#allocation11], 1 }
 0x321   :  { %545 = vsyncpa [#allocation6], 1 }
 0x322   :  { %546 = vsyncpa [#allocation14], 1 }

</bundles_post_ra>
